<compile_context>
chip_gen: v5e
topology: v5e:2x2
jax: 0.10.0
libtpu: 0.0.40
codegen_flags: <defaults>
</compile_context>

<pallas_src>
import functools

import jax
import jax.numpy as jnp
from jax import lax
from jax.experimental import pallas as pl
from jax.experimental.pallas import tpu as pltpu


def _round_up(x, m):
    return (x + m - 1) // m * m


def cross_attention_kernel(img_ref, txt_ref, gamma_ref, beta_ref,
                           img_out_ref, txt_out_ref,
                           txt_mm_ref, txt_acc_ref,
                           *, scale, eps, d_real, matmul_dtype, exp_dtype, approx_recip):
    # img_ref: (Bblk, Ni_blk, Dp), txt_ref: (Bblk, Nt, Dp), gamma/beta: (1, Dp)
    ni = pl.program_id(1)
    d_pad = img_ref.shape[-1]
    inv_d = 1.0 / float(d_real)

    gamma = gamma_ref[...].astype(jnp.float32)   # (1, Dp) — loaded/broadcast once
    beta = beta_ref[...].astype(jnp.float32)     # (1, Dp)

    def layernorm(x):
        # x: (bb, n, Dp) f32.  If Dp > d_real the trailing lanes are zero padding that must
        # not contribute to the statistics; gamma/beta are zero there, so the normalized
        # output stays zero on the padded lanes.
        if d_pad != d_real:
            lane = lax.broadcasted_iota(jnp.int32, (1, 1, d_pad), 2)
            mask = lane < d_real
            x = jnp.where(mask, x, 0.0)
            mu = jnp.sum(x, axis=-1, keepdims=True) * inv_d
            xc = jnp.where(mask, x - mu, 0.0)
        else:
            mu = jnp.sum(x, axis=-1, keepdims=True) * inv_d
            xc = x - mu
        var = jnp.sum(xc * xc, axis=-1, keepdims=True) * inv_d   # biased var, like nn.LayerNorm
        return xc * lax.rsqrt(var + eps) * gamma + beta

    # Text LayerNorm (+ cast to the MXU dtype) computed once per batch block and kept in a
    # persistent VMEM scratch; the text_out f32 accumulator is zeroed at the same time.
    @pl.when(ni == 0)
    def _():
        txt_n = layernorm(txt_ref[...].astype(jnp.float32))
        txt_mm_ref[...] = txt_n.astype(matmul_dtype)
        txt_acc_ref[...] = jnp.zeros_like(txt_acc_ref)

    img_n = layernorm(img_ref[...].astype(jnp.float32))          # (bb, ni_blk, Dp) f32
    img_mm = img_n.astype(matmul_dtype)
    # Fold 1/sqrt(D) into the (ni_blk, D) LHS instead of the (ni_blk, Nt) score matrix.
    img_q = (img_n * scale).astype(matmul_dtype)
    txt_mm = txt_mm_ref[...]

    # Scores: contract the last dim of both operands (no materialized transpose).
    s = jnp.einsum("bnd,bmd->bnm", img_q, txt_mm,
                   preferred_element_type=jnp.float32)            # (bb, ni_blk, Nt) f32

    # Numerically stable softmax over Nt (Nt is never tiled, so this stays single-pass).
    s_max = jnp.max(s, axis=-1, keepdims=True)
    p = jnp.exp((s - s_max).astype(exp_dtype))                    # bf16 EUP path on fast mode
    l = jnp.sum(p.astype(jnp.float32), axis=-1, keepdims=True)
    inv_l = pl.reciprocal(l, approx=True) if approx_recip else 1.0 / l
    attn = (p * inv_l).astype(matmul_dtype)                       # (bb, ni_blk, Nt)

    # image_out = attn @ text_norm : this Ni tile is final, write directly.
    img_out_ref[...] = jnp.einsum(
        "bnm,bmd->bnd", attn, txt_mm,
        preferred_element_type=jnp.float32).astype(img_out_ref.dtype)

    # text_out = attn^T @ image_norm : reduction over Ni tiles -> accumulate in f32 scratch.
    txt_acc_ref[...] += jnp.einsum(
        "bnm,bnd->bmd", attn, img_mm, preferred_element_type=jnp.float32)

    @pl.when(ni == pl.num_programs(1) - 1)
    def _():
        txt_out_ref[...] = txt_acc_ref[...].astype(txt_out_ref.dtype)


def _vmem_capacity_bytes():
    try:
        cap = int(pltpu.get_tpu_info().vmem_capacity_bytes)
        if cap > 0:
            return cap
    except Exception:
        pass
    return 64 * 1024 * 1024   # conservative default (v7x per-core VMEM)


def _divisors_desc(n):
    return [d for d in range(n, 0, -1) if n % d == 0]


def _choose_blocks(B, Ni, Nt, Dp, mm_bytes, budget):
    """Largest (block_b, block_ni) whose per-step VMEM working set fits `budget`, preferring
    >= 2 (ideally an even number of) steps on the parallel batch axis (v7x megacore)."""
    ni_cands = [d for d in _divisors_desc(Ni) if d == Ni or d % 8 == 0] or [Ni]
    b_cands = _divisors_desc(B)

    def step_bytes(bb, bni):
        io = 4 * bb * bni * Dp * 4 + 4 * bb * Nt * Dp * 4      # double-buffered in/out blocks
        scratch = bb * Nt * Dp * (mm_bytes + 4)                 # txt_mm + f32 txt accumulator
        inter = bb * bni * Dp * 16 + bb * bni * Nt * 12 + bb * Nt * Dp * 8
        return io + scratch + inter

    best, best_key = (1, ni_cands[-1]), None
    for bb in b_cands:
        for bni in ni_cands:
            if step_bytes(bb, bni) > budget:
                continue
            b_steps = B // bb
            key = (B == 1 or b_steps >= 2,        # keep both v7x TensorCores busy
                   B == 1 or b_steps % 2 == 0,    # balanced split across the 2 cores
                   bb * bni, bni)
            if best_key is None or key > best_key:
                best_key, best = key, (bb, bni)
    return best


def cross_attention(image_features, text_features, gamma, beta, *,
                    eps=1e-5, matmul_dtype=jnp.bfloat16):
    B, Ni, D = image_features.shape
    _, Nt, _ = text_features.shape
    scale = float(D) ** (-0.5)
    mm_dtype = jax.dtypes.canonicalize_dtype(matmul_dtype)
    fast = mm_dtype == jnp.bfloat16

    # Lane-dense feature dim: pad D up to a multiple of 128 (unmasked stores, full MXU K dim).
    D_pad = _round_up(D, 128)
    if D_pad != D:
        pad = [(0, 0), (0, 0), (0, D_pad - D)]
        img_in = jnp.pad(image_features, pad)
        txt_in = jnp.pad(text_features, pad)
        gamma2d = jnp.pad(gamma.reshape(-1), (0, D_pad - D)).reshape(1, D_pad)
        beta2d = jnp.pad(beta.reshape(-1), (0, D_pad - D)).reshape(1, D_pad)
    else:
        img_in, txt_in = image_features, text_features
        gamma2d, beta2d = gamma.reshape(1, D_pad), beta.reshape(1, D_pad)

    # Generation-aware VMEM budget (64 MiB v7x, 128 MiB v5e/v6e) -> scoped limit + tile sizes.
    vmem_cap = _vmem_capacity_bytes()
    vmem_limit = max(32 * 1024 * 1024, int(vmem_cap * 0.8))
    block_b, block_ni = _choose_blocks(B, Ni, Nt, D_pad, mm_dtype.itemsize,
                                       budget=int(vmem_limit * 0.6))

    # bf16 exp on the fast path when D is small (EUP is the saturating unit on v6e/v7x);
    # keep f32 exp on the full-precision path.
    exp_dtype = jnp.bfloat16 if (fast and D_pad <= 256) else jnp.float32

    kernel = functools.partial(
        cross_attention_kernel, scale=scale, eps=eps, d_real=D,
        matmul_dtype=mm_dtype, exp_dtype=exp_dtype, approx_recip=fast)

    cost = pl.CostEstimate(
        flops=6 * B * Ni * Nt * D_pad + 12 * B * (Ni + Nt) * D_pad,
        transcendentals=B * Ni * Nt + 2 * B * (Ni + Nt),
        bytes_accessed=8 * B * (Ni + Nt) * D_pad,
    )

    img_out, txt_out = pl.pallas_call(
        kernel,
        out_shape=(
            jax.ShapeDtypeStruct((B, Ni, D_pad), image_features.dtype),
            jax.ShapeDtypeStruct((B, Nt, D_pad), text_features.dtype),
        ),
        grid_spec=pltpu.PrefetchScalarGridSpec(
            num_scalar_prefetch=0,
            grid=(B // block_b, Ni // block_ni),     # (batch: parallel, Ni tiles: reduction)
            in_specs=[
                pl.BlockSpec((block_b, block_ni, D_pad), lambda b, n: (b, n, 0)),  # image tile
                pl.BlockSpec((block_b, Nt, D_pad), lambda b, n: (b, 0, 0)),        # text block
                pl.BlockSpec((1, D_pad), lambda b, n: (0, 0)),                     # LN weight
                pl.BlockSpec((1, D_pad), lambda b, n: (0, 0)),                     # LN bias
            ],
            out_specs=[
                pl.BlockSpec((block_b, block_ni, D_pad), lambda b, n: (b, n, 0)),
                # text_out: same block across the Ni axis -> resident accumulator output.
                pl.BlockSpec((block_b, Nt, D_pad), lambda b, n: (b, 0, 0)),
            ],
            scratch_shapes=[
                pltpu.VMEM((block_b, Nt, D_pad), mm_dtype),      # normalized text (reused)
                pltpu.VMEM((block_b, Nt, D_pad), jnp.float32),   # text_out f32 accumulator
            ],
        ),
        compiler_params=pltpu.CompilerParams(
            dimension_semantics=("parallel", "arbitrary"),
            vmem_limit_bytes=vmem_limit,
        ),
        cost_estimate=cost,
    )(img_in, txt_in, gamma2d, beta2d)

    if D_pad != D:
        img_out = img_out[..., :D]
        txt_out = txt_out[..., :D]
    return img_out, txt_out


def cross_attention_ref(image_features, text_features, gamma, beta, *, eps=1e-5):
    D = image_features.shape[-1]
    scale = float(D) ** (-0.5)

    def ln(x):
        mu = jnp.mean(x, axis=-1, keepdims=True)
        var = jnp.mean((x - mu) ** 2, axis=-1, keepdims=True)
        return (x - mu) / jnp.sqrt(var + eps) * gamma + beta

    img_n = ln(image_features)
    txt_n = ln(text_features)
    attn = jax.nn.softmax(jnp.einsum("bnd,bmd->bnm", img_n, txt_n) * scale, axis=-1)
    img_out = jnp.einsum("bnm,bmd->bnd", attn, txt_n)
    txt_out = jnp.einsum("bnm,bnd->bmd", attn, img_n)
    return img_out, txt_out


if __name__ == "__main__":
    B, Ni, Nt, D = 4, 16, 8, 32
    key = jax.random.PRNGKey(0)
    k_img, k_txt = jax.random.split(key)
    image_features = jax.random.normal(k_img, (B, Ni, D), dtype=jnp.float32)
    text_features = jax.random.normal(k_txt, (B, Nt, D), dtype=jnp.float32)

    # nn.LayerNorm(dim) default parameters: weight = ones, bias = zeros
    gamma = jnp.ones((D,), dtype=jnp.float32)
    beta = jnp.zeros((D,), dtype=jnp.float32)

    img_ref_o, txt_ref_o = cross_attention_ref(image_features, text_features, gamma, beta)

    # Fast path: bf16 MXU operands, bf16 exp, EUP approximate reciprocal.
    img_out, txt_out = cross_attention(image_features, text_features, gamma, beta,
                                       matmul_dtype=jnp.bfloat16)
    jax.block_until_ready((img_out, txt_out))
    assert jnp.allclose(img_out, img_ref_o, atol=5e-2, rtol=5e-2)
    assert jnp.allclose(txt_out, txt_ref_o, atol=5e-2, rtol=5e-2)

    # Full-precision path: f32 operands, f32 exp, EXACT reciprocal (residual error is only
    # MXU f32 emulation rounding).
    img_out32, txt_out32 = cross_attention(image_features, text_features, gamma, beta,
                                           matmul_dtype=jnp.float32)
    jax.block_until_ready((img_out32, txt_out32))
    assert jnp.allclose(img_out32, img_ref_o, atol=1e-2, rtol=1e-2)
    assert jnp.allclose(txt_out32, txt_ref_o, atol=1e-2, rtol=1e-2)

    print("KERNEL_OK")
</pallas_src>

<mosaic_0001>
module attributes {stable_mosaic.version = 11 : i64} {
  func.func @cross_attention_kernel(%arg0: i32, %arg1: i32, %arg2: memref<2x16x128xf32, #tpu.memory_space<vmem>>, %arg3: memref<2x8x128xf32, #tpu.memory_space<vmem>>, %arg4: memref<1x128xf32, #tpu.memory_space<vmem>>, %arg5: memref<1x128xf32, #tpu.memory_space<vmem>>, %arg6: memref<2x16x128xf32, #tpu.memory_space<vmem>>, %arg7: memref<2x8x128xf32, #tpu.memory_space<vmem>>, %arg8: memref<2x8x128xbf16, #tpu.memory_space<vmem>>, %arg9: memref<2x8x128xf32, #tpu.memory_space<vmem>>) attributes {dimension_semantics = [#tpu.dimension_semantics<parallel>, #tpu.dimension_semantics<arbitrary>], iteration_bounds = array<i64: 2, 1>, scalar_prefetch = 0 : i64, scratch_operands = 2 : i64, tpu.core_type = #tpu.core_type<tc>, window_params = [{transform_indices = @transform_0, window_bounds = array<i64: 2, 16, 128>}, {transform_indices = @transform_1, window_bounds = array<i64: 2, 8, 128>}, {pipeline_mode = #tpu.pipeline_mode<synchronous>, transform_indices = @transform_2, window_bounds = array<i64: 1, 128>}, {pipeline_mode = #tpu.pipeline_mode<synchronous>, transform_indices = @transform_3, window_bounds = array<i64: 1, 128>}, {transform_indices = @transform_4, window_bounds = array<i64: 2, 16, 128>}, {transform_indices = @transform_5, window_bounds = array<i64: 2, 8, 128>}]} {
    %c0 = arith.constant 0 : index
    %c0_0 = arith.constant 0 : index
    %0 = vector.load %arg4[%c0, %c0_0] : memref<1x128xf32, #tpu.memory_space<vmem>>, vector<1x128xf32>
    %c0_1 = arith.constant 0 : index
    %c0_2 = arith.constant 0 : index
    %1 = vector.load %arg5[%c0_1, %c0_2] : memref<1x128xf32, #tpu.memory_space<vmem>>, vector<1x128xf32>
    %c0_i32 = arith.constant 0 : i32
    %2 = arith.cmpi eq, %arg1, %c0_i32 : i32
    %3 = arith.extui %2 : i1 to i32
    %c0_i32_3 = arith.constant 0 : i32
    %4 = arith.cmpi ne, %3, %c0_i32_3 : i32
    scf.if %4 {
      %c0_33 = arith.constant 0 : index
      %c0_34 = arith.constant 0 : index
      %c0_35 = arith.constant 0 : index
      %68 = vector.load %arg3[%c0_33, %c0_34, %c0_35] : memref<2x8x128xf32, #tpu.memory_space<vmem>>, vector<2x8x128xf32>
      %69 = tpu.iota {dimensions = array<i32: 2>} : vector<1x1x128xi32>
      %c32_i32_36 = arith.constant 32 : i32
      %70 = vector.broadcast %c32_i32_36 : i32 to vector<1x1x128xi32>
      %71 = arith.cmpi slt, %69, %70 : vector<1x1x128xi32>
      %cst_37 = arith.constant 0.000000e+00 : f32
      %72 = vector.shape_cast %71 : vector<1x1x128xi1> to vector<1x1x128xi1>
      %73 = vector.broadcast %72 : vector<1x1x128xi1> to vector<2x8x128xi1>
      %74 = vector.broadcast %cst_37 : f32 to vector<2x8x128xf32>
      %75 = arith.select %73, %68, %74 : vector<2x8x128xi1>, vector<2x8x128xf32>
      %cst_38 = arith.constant dense<0.000000e+00> : vector<2x8xf32>
      %76 = vector.multi_reduction <add>, %75, %cst_38 [2] : vector<2x8x128xf32> to vector<2x8xf32>
      %77 = vector.shape_cast %76 : vector<2x8xf32> to vector<2x8x1xf32>
      %cst_39 = arith.constant 3.125000e-02 : f32
      %78 = vector.broadcast %cst_39 : f32 to vector<2x8x1xf32>
      %79 = arith.mulf %77, %78 : vector<2x8x1xf32>
      %80 = vector.broadcast %79 : vector<2x8x1xf32> to vector<2x8x128xf32>
      %81 = arith.subf %75, %80 : vector<2x8x128xf32>
      %cst_40 = arith.constant 0.000000e+00 : f32
      %82 = vector.shape_cast %71 : vector<1x1x128xi1> to vector<1x1x128xi1>
      %83 = vector.broadcast %82 : vector<1x1x128xi1> to vector<2x8x128xi1>
      %84 = vector.broadcast %cst_40 : f32 to vector<2x8x128xf32>
      %85 = arith.select %83, %81, %84 : vector<2x8x128xi1>, vector<2x8x128xf32>
      %86 = arith.mulf %85, %85 : vector<2x8x128xf32>
      %cst_41 = arith.constant dense<0.000000e+00> : vector<2x8xf32>
      %87 = vector.multi_reduction <add>, %86, %cst_41 [2] : vector<2x8x128xf32> to vector<2x8xf32>
      %88 = vector.shape_cast %87 : vector<2x8xf32> to vector<2x8x1xf32>
      %cst_42 = arith.constant 3.125000e-02 : f32
      %89 = vector.broadcast %cst_42 : f32 to vector<2x8x1xf32>
      %90 = arith.mulf %88, %89 : vector<2x8x1xf32>
      %cst_43 = arith.constant 9.99999974E-6 : f32
      %91 = vector.broadcast %cst_43 : f32 to vector<2x8x1xf32>
      %92 = arith.addf %90, %91 : vector<2x8x1xf32>
      %93 = math.rsqrt %92 : vector<2x8x1xf32>
      %94 = vector.broadcast %93 : vector<2x8x1xf32> to vector<2x8x128xf32>
      %95 = arith.mulf %85, %94 : vector<2x8x128xf32>
      %96 = vector.shape_cast %0 : vector<1x128xf32> to vector<1x1x128xf32>
      %97 = vector.broadcast %96 : vector<1x1x128xf32> to vector<2x8x128xf32>
      %98 = arith.mulf %95, %97 : vector<2x8x128xf32>
      %99 = vector.shape_cast %1 : vector<1x128xf32> to vector<1x1x128xf32>
      %100 = vector.broadcast %99 : vector<1x1x128xf32> to vector<2x8x128xf32>
      %101 = arith.addf %98, %100 : vector<2x8x128xf32>
      %102 = arith.truncf %101 : vector<2x8x128xf32> to vector<2x8x128xbf16>
      %c0_44 = arith.constant 0 : index
      %c0_45 = arith.constant 0 : index
      %c0_46 = arith.constant 0 : index
      %103 = vector.load %arg8[%c0_44, %c0_45, %c0_46] : memref<2x8x128xbf16, #tpu.memory_space<vmem>>, vector<2x8x128xbf16>
      tpu.vector_store %arg8[%c0_44, %c0_45, %c0_46], %102 {strides = array<i32>} : memref<2x8x128xbf16, #tpu.memory_space<vmem>>, vector<2x8x128xbf16>,
      %cst_47 = arith.constant 0.000000e+00 : f32
      %104 = vector.broadcast %cst_47 : f32 to vector<2x8x128xf32>
      %c0_48 = arith.constant 0 : index
      %c0_49 = arith.constant 0 : index
      %c0_50 = arith.constant 0 : index
      %105 = vector.load %arg9[%c0_48, %c0_49, %c0_50] : memref<2x8x128xf32, #tpu.memory_space<vmem>>, vector<2x8x128xf32>
      tpu.vector_store %arg9[%c0_48, %c0_49, %c0_50], %104 {strides = array<i32>} : memref<2x8x128xf32, #tpu.memory_space<vmem>>, vector<2x8x128xf32>,
    } else {
    }
    %c0_4 = arith.constant 0 : index
    %c0_5 = arith.constant 0 : index
    %c0_6 = arith.constant 0 : index
    %5 = vector.load %arg2[%c0_4, %c0_5, %c0_6] : memref<2x16x128xf32, #tpu.memory_space<vmem>>, vector<2x16x128xf32>
    %6 = tpu.iota {dimensions = array<i32: 2>} : vector<1x1x128xi32>
    %c32_i32 = arith.constant 32 : i32
    %7 = vector.broadcast %c32_i32 : i32 to vector<1x1x128xi32>
    %8 = arith.cmpi slt, %6, %7 : vector<1x1x128xi32>
    %cst = arith.constant 0.000000e+00 : f32
    %9 = vector.shape_cast %8 : vector<1x1x128xi1> to vector<1x1x128xi1>
    %10 = vector.broadcast %9 : vector<1x1x128xi1> to vector<2x16x128xi1>
    %11 = vector.broadcast %cst : f32 to vector<2x16x128xf32>
    %12 = arith.select %10, %5, %11 : vector<2x16x128xi1>, vector<2x16x128xf32>
    %cst_7 = arith.constant dense<0.000000e+00> : vector<2x16xf32>
    %13 = vector.multi_reduction <add>, %12, %cst_7 [2] : vector<2x16x128xf32> to vector<2x16xf32>
    %14 = vector.shape_cast %13 : vector<2x16xf32> to vector<2x16x1xf32>
    %cst_8 = arith.constant 3.125000e-02 : f32
    %15 = vector.broadcast %cst_8 : f32 to vector<2x16x1xf32>
    %16 = arith.mulf %14, %15 : vector<2x16x1xf32>
    %17 = vector.broadcast %16 : vector<2x16x1xf32> to vector<2x16x128xf32>
    %18 = arith.subf %12, %17 : vector<2x16x128xf32>
    %cst_9 = arith.constant 0.000000e+00 : f32
    %19 = vector.shape_cast %8 : vector<1x1x128xi1> to vector<1x1x128xi1>
    %20 = vector.broadcast %19 : vector<1x1x128xi1> to vector<2x16x128xi1>
    %21 = vector.broadcast %cst_9 : f32 to vector<2x16x128xf32>
    %22 = arith.select %20, %18, %21 : vector<2x16x128xi1>, vector<2x16x128xf32>
    %23 = arith.mulf %22, %22 : vector<2x16x128xf32>
    %cst_10 = arith.constant dense<0.000000e+00> : vector<2x16xf32>
    %24 = vector.multi_reduction <add>, %23, %cst_10 [2] : vector<2x16x128xf32> to vector<2x16xf32>
    %25 = vector.shape_cast %24 : vector<2x16xf32> to vector<2x16x1xf32>
    %cst_11 = arith.constant 3.125000e-02 : f32
    %26 = vector.broadcast %cst_11 : f32 to vector<2x16x1xf32>
    %27 = arith.mulf %25, %26 : vector<2x16x1xf32>
    %cst_12 = arith.constant 9.99999974E-6 : f32
    %28 = vector.broadcast %cst_12 : f32 to vector<2x16x1xf32>
    %29 = arith.addf %27, %28 : vector<2x16x1xf32>
    %30 = math.rsqrt %29 : vector<2x16x1xf32>
    %31 = vector.broadcast %30 : vector<2x16x1xf32> to vector<2x16x128xf32>
    %32 = arith.mulf %22, %31 : vector<2x16x128xf32>
    %33 = vector.shape_cast %0 : vector<1x128xf32> to vector<1x1x128xf32>
    %34 = vector.broadcast %33 : vector<1x1x128xf32> to vector<2x16x128xf32>
    %35 = arith.mulf %32, %34 : vector<2x16x128xf32>
    %36 = vector.shape_cast %1 : vector<1x128xf32> to vector<1x1x128xf32>
    %37 = vector.broadcast %36 : vector<1x1x128xf32> to vector<2x16x128xf32>
    %38 = arith.addf %35, %37 : vector<2x16x128xf32>
    %39 = arith.truncf %38 : vector<2x16x128xf32> to vector<2x16x128xbf16>
    %cst_13 = arith.constant 0.176776692 : f32
    %40 = vector.broadcast %cst_13 : f32 to vector<2x16x128xf32>
    %41 = arith.mulf %38, %40 : vector<2x16x128xf32>
    %42 = arith.truncf %41 : vector<2x16x128xf32> to vector<2x16x128xbf16>
    %c0_14 = arith.constant 0 : index
    %c0_15 = arith.constant 0 : index
    %c0_16 = arith.constant 0 : index
    %43 = vector.load %arg8[%c0_14, %c0_15, %c0_16] : memref<2x8x128xbf16, #tpu.memory_space<vmem>>, vector<2x8x128xbf16>
    "tpu.trace_start"() <{level = 10 : i32, message = "bnd,bmd->bnm"}> : () -> ()
    %cst_17 = arith.constant dense<0.000000e+00> : vector<2x16x8xf32>
    %44 = tpu.matmul %42, %43, %cst_17 {dimension_numbers = #tpu.dot_dimension_numbers<[2], [2], [1], [1], [0, 0, 0, 1, 1, 1], [0], [0]>} : vector<2x16x128xbf16>, vector<2x8x128xbf16>, vector<2x16x8xf32> -> vector<2x16x8xf32>
    "tpu.trace_stop"() : () -> ()
    %cst_18 = arith.constant dense<0xFF800000> : vector<2x16xf32>
    %45 = vector.multi_reduction <maximumf>, %44, %cst_18 [2] : vector<2x16x8xf32> to vector<2x16xf32>
    %46 = vector.shape_cast %45 : vector<2x16xf32> to vector<2x16x1xf32>
    %47 = vector.broadcast %46 : vector<2x16x1xf32> to vector<2x16x8xf32>
    %48 = arith.subf %44, %47 : vector<2x16x8xf32>
    %49 = arith.truncf %48 : vector<2x16x8xf32> to vector<2x16x8xbf16>
    %50 = math.exp %49 : vector<2x16x8xbf16>
    %51 = arith.extf %50 : vector<2x16x8xbf16> to vector<2x16x8xf32>
    %cst_19 = arith.constant dense<0.000000e+00> : vector<2x16xf32>
    %52 = vector.multi_reduction <add>, %51, %cst_19 [2] : vector<2x16x8xf32> to vector<2x16xf32>
    %53 = vector.shape_cast %52 : vector<2x16xf32> to vector<2x16x1xf32>
    %54 = tpu.reciprocal %53 {approx = true} : vector<2x16x1xf32> -> vector<2x16x1xf32>
    %55 = arith.extf %50 : vector<2x16x8xbf16> to vector<2x16x8xf32>
    %56 = vector.broadcast %54 : vector<2x16x1xf32> to vector<2x16x8xf32>
    %57 = arith.mulf %55, %56 : vector<2x16x8xf32>
    %58 = arith.truncf %57 : vector<2x16x8xf32> to vector<2x16x8xbf16>
    "tpu.trace_start"() <{level = 10 : i32, message = "bnm,bmd->bnd"}> : () -> ()
    %cst_20 = arith.constant dense<0.000000e+00> : vector<2x16x128xf32>
    %59 = tpu.matmul %58, %43, %cst_20 {dimension_numbers = #tpu.dot_dimension_numbers<[2], [1], [1], [2], [0, 0, 0, 1, 1, 2], [0], [0]>} : vector<2x16x8xbf16>, vector<2x8x128xbf16>, vector<2x16x128xf32> -> vector<2x16x128xf32>
    "tpu.trace_stop"() : () -> ()
    %c0_21 = arith.constant 0 : index
    %c0_22 = arith.constant 0 : index
    %c0_23 = arith.constant 0 : index
    %60 = vector.load %arg6[%c0_21, %c0_22, %c0_23] : memref<2x16x128xf32, #tpu.memory_space<vmem>>, vector<2x16x128xf32>
    tpu.vector_store %arg6[%c0_21, %c0_22, %c0_23], %59 {strides = array<i32>} : memref<2x16x128xf32, #tpu.memory_space<vmem>>, vector<2x16x128xf32>,
    %c0_24 = arith.constant 0 : index
    %c0_25 = arith.constant 0 : index
    %c0_26 = arith.constant 0 : index
    %61 = vector.load %arg9[%c0_24, %c0_25, %c0_26] : memref<2x8x128xf32, #tpu.memory_space<vmem>>, vector<2x8x128xf32>
    "tpu.trace_start"() <{level = 10 : i32, message = "bnm,bnd->bmd"}> : () -> ()
    %cst_27 = arith.constant dense<0.000000e+00> : vector<2x8x128xf32>
    %62 = tpu.matmul %58, %39, %cst_27 {dimension_numbers = #tpu.dot_dimension_numbers<[1], [1], [2], [2], [0, 0, 0, 2, 1, 2], [0], [0]>} : vector<2x16x8xbf16>, vector<2x16x128xbf16>, vector<2x8x128xf32> -> vector<2x8x128xf32>
    "tpu.trace_stop"() : () -> ()
    %63 = arith.addf %61, %62 : vector<2x8x128xf32>
    %c0_28 = arith.constant 0 : index
    %c0_29 = arith.constant 0 : index
    %c0_30 = arith.constant 0 : index
    %64 = vector.load %arg9[%c0_28, %c0_29, %c0_30] : memref<2x8x128xf32, #tpu.memory_space<vmem>>, vector<2x8x128xf32>
    tpu.vector_store %arg9[%c0_28, %c0_29, %c0_30], %63 {strides = array<i32>} : memref<2x8x128xf32, #tpu.memory_space<vmem>>, vector<2x8x128xf32>,
    %c0_i32_31 = arith.constant 0 : i32
    %65 = arith.cmpi eq, %arg1, %c0_i32_31 : i32
    %66 = arith.extui %65 : i1 to i32
    %c0_i32_32 = arith.constant 0 : i32
    %67 = arith.cmpi ne, %66, %c0_i32_32 : i32
    scf.if %67 {
      %c0_33 = arith.constant 0 : index
      %c0_34 = arith.constant 0 : index
      %c0_35 = arith.constant 0 : index
      %68 = vector.load %arg9[%c0_33, %c0_34, %c0_35] : memref<2x8x128xf32, #tpu.memory_space<vmem>>, vector<2x8x128xf32>
      %c0_36 = arith.constant 0 : index
      %c0_37 = arith.constant 0 : index
      %c0_38 = arith.constant 0 : index
      %69 = vector.load %arg7[%c0_36, %c0_37, %c0_38] : memref<2x8x128xf32, #tpu.memory_space<vmem>>, vector<2x8x128xf32>
      tpu.vector_store %arg7[%c0_36, %c0_37, %c0_38], %68 {strides = array<i32>} : memref<2x8x128xf32, #tpu.memory_space<vmem>>, vector<2x8x128xf32>,
    } else {
    }
    return
  }
  func.func @transform_0(%arg0: i32, %arg1: i32) -> (i32, i32, i32) {
    %c0_i32 = arith.constant 0 : i32
    %c0_i32_0 = arith.constant 0 : i32
    return %arg0, %arg1, %c0_i32 : i32, i32, i32
  }
  func.func @transform_1(%arg0: i32, %arg1: i32) -> (i32, i32, i32) {
    %c0_i32 = arith.constant 0 : i32
    %c0_i32_0 = arith.constant 0 : i32
    %c0_i32_1 = arith.constant 0 : i32
    return %arg0, %c0_i32, %c0_i32_0 : i32, i32, i32
  }
  func.func @transform_2(%arg0: i32, %arg1: i32) -> (i32, i32) {
    %c0_i32 = arith.constant 0 : i32
    %c0_i32_0 = arith.constant 0 : i32
    %c0_i32_1 = arith.constant 0 : i32
    return %c0_i32, %c0_i32_0 : i32, i32
  }
  func.func @transform_3(%arg0: i32, %arg1: i32) -> (i32, i32) {
    %c0_i32 = arith.constant 0 : i32
    %c0_i32_0 = arith.constant 0 : i32
    %c0_i32_1 = arith.constant 0 : i32
    return %c0_i32, %c0_i32_0 : i32, i32
  }
  func.func @transform_4(%arg0: i32, %arg1: i32) -> (i32, i32, i32) {
    %c0_i32 = arith.constant 0 : i32
    %c0_i32_0 = arith.constant 0 : i32
    return %arg0, %arg1, %c0_i32 : i32, i32, i32
  }
  func.func @transform_5(%arg0: i32, %arg1: i32) -> (i32, i32, i32) {
    %c0_i32 = arith.constant 0 : i32
    %c0_i32_0 = arith.constant 0 : i32
    %c0_i32_1 = arith.constant 0 : i32
    return %arg0, %c0_i32, %c0_i32_0 : i32, i32, i32
  }
}

</mosaic_0001>

<bundles_post_ra>
// kernel: tpu_custom_call.1
= control target key start
LH: loop header
LB: loop body
LE: loop exit
PB: predicated region body
PF: predicated region fallthrough
CT: control target
= control target key end

     0   :  { %s1565_s0 = inlined_call_operand.hbm [shape: f32[4,16,128], index: 0, kind: input, shape index: {}]   ;;  %s1566_s1 = inlined_call_operand.hbm [shape: f32[4,8,128], index: 1, kind: input, shape index: {}]   ;;  %s1567_s2 = inlined_call_operand.vmem [shape: f32[1,128], index: 2, kind: input, shape index: {}]   ;;  %s1568_s3 = inlined_call_operand.vmem [shape: f32[1,128], index: 3, kind: input, shape index: {}]   ;;  %s1569_s4 = inlined_call_operand.hbm [shape: f32[4,16,128], index: 4, kind: output, shape index: {0}]   ;;  %s1570_s5 = inlined_call_operand.hbm [shape: f32[4,8,128], index: 5, kind: output, shape index: {1}]  }
   0x1   :  { %1572 = sst [smem:[#allocation17_spill]] %s1565_s0 }
   0x2   :  { %11 = vsyncpa [#allocation5], 0 }
   0x3   :  { %13 = vsyncpa [#allocation5 + $0x1], 0 }
   0x4   :  { %14 = vsyncpa [#allocation8], 0 }
   0x5   :  { %16 = vsyncpa [#allocation8 + $0x1], 0 }
   0x6   :  { %17 = vsyncpa [#allocation6], 0 }
   0x7   :  { %19 = vsyncpa [#allocation6 + $0x1], 0 }
   0x8   :  { %20 = vsyncpa [#allocation11], 0 }
   0x9   :  { %22 = vsyncpa [#allocation11 + $0x1], 0  ;;  %s1322_s18 = smov 0   ;;  %s1324_s19 = smov 0  }
   0xa   :  { %s1326_s20 = smov 0   ;;  %s1328_s21 = smov 0  }
   0xb   :  { %s1330_s22 = smov 0   ;;  %s1332_s23 = smov 0  }
   0xc LB: > { %s958_s24 = sadd.s32 4294967295, %s1286_s23   ;;  %s959_s25 = sadd.s32 4294967294, %s1286_s23   ;;  %s1286_s23 = sphi %s1332_s23, %s28_s23   ;;  %s1282_s22 = sphi %s1330_s22, %s1587_s22   ;;  %s1278_s21 = sphi %s1328_s21, %s1586_s21   ;;  %s1274_s20 = sphi %s1326_s20, %s1585_s20   ;;  %s1270_s19 = sphi %s1324_s19, %s1584_s19   ;;  %s1266_s18 = sphi %s1322_s18, %s1583_s18  }
   0xd   : > { %s40_s26 = sadd.s32 1, %s1282_s22  ;;  %s49_s27 = sadd.s32 1, %s1274_s20 }
   0xe   : > { %p42_p0 = scmp.ge.s32.totalorder %s40_s26, 2  ;;  %p56_p1 = scmp.ne.s32.totalorder %s1274_s20, %s1270_s19 }
   0xf   : > { %p57_p2 = scmp.eq.s32.totalorder %s1286_s23, 0  ;;  %p62_p3 = scmp.ne.s32.totalorder %s1270_s19, %s1266_s18 }
  0x10   : > { %s1589_s26 = smov (%p42_p0, %s40_s26), 0  ;;  %p63_p5 = scmp.eq.s32.totalorder %s958_s24, 0 }
  0x11   : > { %1573 = sst [smem:[#allocation16_spill]] %s1589_s26  ;;  %p1363_p4 = por %p57_p2, %p56_p1 }
  0x12   : > { %s44_s29 = ssub.s32 %s1282_s22, %s1589_s26  ;;  %p156_p6 = scmp.eq.s32.totalorder %s958_s24, 1 }
  0x13   : > { %p47_p7 = scmp.eq.s32.totalorder %s44_s29, 0  ;;  %p1369_p8 = por %p63_p5, %p62_p3 }
  0x14   : > { %p1373_p9 = por %p156_p6, %p56_p1  ;;  %p162_p10 = scmp.eq.s32.totalorder %s959_s25, 1 }
  0x15   : > { %s1378_s7 = scalar_select %p47_p7, %s1274_s20, %s49_s27  }
  0x16   : > { %p1380_p11 = por %p162_p10, %p62_p3  ;;  %p961_p12 = scmp.ge.s32.totalorder %s1286_s23, 2 }
  0x17   : > { %p1020_p13 = scmp.lt.s32.totalorder %s1286_s23, 2  ;;  %s1387_s9 = sand.u32 1, %s1274_s20  }
  0x18   : > { %s962_s10 = sshll.u32 %s1387_s9, 5  ;;  %s988_s11 = sshll.u32 %s1282_s22, 5 }
  0x19   : > { %s1578_s0 = sld [smem:[#allocation17_spill]]  ;;  %s218_s15 = scalar_lea.vmem [#allocation4], %s962_s10 }
  0x1a   : > { %s229_s16 = sshll.u32 %s218_s15, 4  ;;  %p1396_p0 = pnand %p1020_p13, %p1363_p4  ;;  %s230_s16 = int_to_ptr.vmem [resolvable:$true] %s229_s16 }
  0x1b   : > { %p969_p1 = scmp.ge.s32.totalorder %s1286_s23, 1  ;;  %s215_s25 = scalar_lea.sflag [#allocation5], %s1387_s9 }
  0x1c   : > { %s1288_s27 = smov 128   ;;  %s1289_s29 = smov 8  }
  0x1d   : > { %p259_p2 = scmp.lt.s32.totalorder %s1286_s23, 3  ;;  %s966_s10 = sshll.u32 %s1387_s9, 4 }
  0x1e   : > { %s240_s26 = scalar_lea.sflag [#allocation8], %s1387_s9 }
  0x1f   : > { %s226_s14 = scalar_lea.hbm %s1578_s0, %s988_s11  ;;  %s989_s11 = sshll.u32 %s1282_s22, 4 }
  0x20   : > { %s227_s17 = sshll.u32 %s226_s14, 4  ;;  %p260_p3 = pnand %p969_p1, %p259_p2  ;;  %s228_s17 = int_to_ptr.hbm [resolvable:$true] %s227_s17 }
  0x21   : > { %1009 = dma.hbm_to_vmem [thread:$0]  (!%p1396_p0), %s228_s17, 512, %s230_s16, %s215_s25, %s1288_s27, %s1288_s27, %s1289_s29  }
  0x22   : > { %s248_s28 = scalar_lea.hbm %s1566_s1, %s989_s11  ;;  %s243_s14 = scalar_lea.vmem [#allocation7], %s966_s10 }
  0x23   : > { %s251_s15 = sshll.u32 %s243_s14, 4  ;;  %s249_s0 = sshll.u32 %s248_s28, 4  ;;  %s252_s15 = int_to_ptr.vmem [resolvable:$true] %s251_s15  ;;  %s250_s0 = int_to_ptr.hbm [resolvable:$true] %s249_s0 }
  0x24   : > { %1012 = dma.hbm_to_vmem [thread:$0]  (!%p1396_p0), %s250_s0, 256, %s252_s15, %s240_s26, %s1288_s27, %s1288_s27, %s1289_s29  }
  0x25   : > { %263 = sbr.rel (%p260_p3) target bundleno = 1059 (0x423), region = 36  ;;  %s1414_s16 = sand.u32 (!%p260_p3), 1, %s1270_s19  }
  0x26   : > { %s970_s17 = sshll.u32 (!%p260_p3), %s1414_s16, 5  ;;  %s266_s25 = scalar_lea.sflag (!%p260_p3), [#allocation5], %s1414_s16 }
  0x27   : > { %s269_s11 = scalar_lea.vmem (!%p260_p3), [#allocation4], %s970_s17 }
  0x2a   : > { %1249 = dma.done.wait (%p1369_p8), %s266_s25, 512  }
  0x2b   : > { %1251 = vsyncadd (%p1369_p8), %s266_s25, 4294966784  ;;  %s971_s0 = sshll.u32 %s1414_s16, 4  ;;  %s276_s26 = scalar_lea.sflag [#allocation8], %s1414_s16 }
  0x2c   : > { %s279_s9 = scalar_lea.vmem [#allocation7], %s971_s0 }
  0x2d   : > { %1253 = dma.done.wait (%p1369_p8), %s276_s26, 256  }
  0x2e   : > { %1255 = vsyncadd (%p1369_p8), %s276_s26, 4294967040  ;;  %v332_v0 = vlaneseq  ;;  %v399_v2 = vld [vmem:[%s269_s11 + $0x10] sm:$0xff]  ;;  %v397_v3 = vld [vmem:[%s269_s11] sm:$0xff]  ;;  %s309_s10 = scalar_lea.vmem [#allocation9], %s970_s17  ;;  %s991_s13 = sshll.u32 %s1278_s21, 5 }
  0x2f   : > { %v330_v4 = vld [vmem:[%s279_s9] sm:$0xff]  ;;  %v400_v8 = vld [vmem:[%s269_s11 + $0x18] sm:$0xff]  ;;  %v398_v9 = vld [vmem:[%s269_s11 + $0x8] sm:$0xff]  ;;  %s795_s12 = sshll.u32 %s309_s10, 4  ;;  %s794_s15 = scalar_lea.hbm %s1569_s4, %s991_s13  ;;  %s796_s12 = int_to_ptr.vmem [resolvable:$true] %s795_s12 }
  0x30   : > { %v333_v1 = vand.u32 127, %v332_v0  ;;  %v331_v10 = vld [vmem:[%s279_s9 + $0x8] sm:$0xff]  ;;  %s797_s17 = sshll.u32 %s794_s15, 4  ;;  %s775_s25 = scalar_lea.sflag [#allocation6], %s1414_s16  ;;  %s798_s17 = int_to_ptr.hbm [resolvable:$true] %s797_s17 }
  0x31   : > { %s1182_s11 = sshra.s32 %s798_s17, 4  ;;  %s1188_s24 = scalar_lea.hbm %s1569_s4, 64  ;;  %s1183_s11 = int_to_ptr.hbm [resolvable:$true] %s1182_s11 }
  0x32   : > { %vm334_vm0 = vcmp.lt.s32.totalorder %v333_v1, 32  ;;  %s1184_s26 = scalar_lea.hbm %s1183_s11, 32  ;;  %p1189_p7 = scmp.lt.s32.totalorder %s1183_s11, %s1569_s4 }
  0x33   : > { %v408_v5 = vsel %vm334_vm0, %v399_v2, 0.0  ;;  %v406_v6 = vsel %vm334_vm0, %v397_v3, 0.0  ;;  %v337_v7 = vsel %vm334_vm0, %v330_v4, 0.0  ;;  %v409_v11 = vsel %vm334_vm0, %v400_v8, 0.0  ;;  %p1185_p4 = scmp.ne.s32.totalorder %s1183_s11, %s1184_s26  ;;  %p1190_p8 = scmp.lt.s32.totalorder %s1188_s24, %s1184_s26 }
  0x34   : > { %414 = vadd.xlane.f32.xlu2 %v408_v5  ;;  %410 = vadd.xlane.f32.xlu1 %v406_v6  ;;  %v407_v12 = vsel %vm334_vm0, %v398_v9, 0.0  ;;  %v338_v13 = vsel %vm334_vm0, %v331_v10, 0.0 }
  0x35   : > { %339 = vadd.xlane.f32.xlu0 %v337_v7  ;;  %p1186_p5 = pnand %p1185_p4, %p1373_p9  ;;  %p1191_p10 = por %p1190_p8, %p1189_p7 }
  0x37   : > { %p1187_p6 = pneg %p1186_p5 }
  0x39   : > { %p1192_p13 = pnand %p1191_p10, %p1187_p6 }
  0x3c   : > { %416 = vadd.xlane.f32.xlu2 %v409_v11  ;;  %412 = vadd.xlane.f32.xlu1 %v407_v12 }
  0x3d   : > { %341 = vadd.xlane.f32.xlu0 %v338_v13 }
  0xa7   : > { %v415_v14 = vpop.xlane.xlu2 %414  ;;  %v411_v15 = vpop.xlane.xlu1 %410 }
  0xa8   : > { %v418_v16 = vmul.f32 0.03125, %v411_v15  ;;  %v340_v17 = vpop.xlane.xlu0 %339  ;;  %v420_v33 = vmul.f32 0.03125, %v415_v14 }
  0xa9   : > { %v343_v18 = vmul.f32 0.03125, %v340_v17 }
  0xaa   : > { %v422_v19 = vsub.f32 %v406_v6, %v418_v16  ;;  %v424_v41 = vsub.f32 %v408_v5, %v420_v33 }
  0xab   : > { %v345_v20 = vsub.f32 %v337_v7, %v343_v18 }
  0xac   : > { %v1439_v21 = vsel %vm334_vm0, %v422_v19, 0.0  ;;  %v1464_v42 = vsel %vm334_vm0, %v424_v41, 0.0 }
  0xad   : > { %v430_v22 = vmul.f32 %v1439_v21, %v1439_v21  ;;  %v1444_v23 = vsel %vm334_vm0, %v345_v20, 0.0  ;;  %v432_v43 = vmul.f32 %v1464_v42, %v1464_v42 }
  0xae   : > { %v349_v24 = vmul.f32 %v1444_v23, %v1444_v23 }
  0xaf   : > { %v417_v25 = vpop.xlane.xlu2 %416  ;;  %434 = vadd.xlane.f32.xlu2 %v430_v22  ;;  %v413_v26 = vpop.xlane.xlu1 %412 }
  0xb0   : > { %v421_v27 = vmul.f32 0.03125, %v417_v25  ;;  %v419_v28 = vmul.f32 0.03125, %v413_v26  ;;  %351 = vadd.xlane.f32.xlu0 %v349_v24  ;;  %v342_v29 = vpop.xlane.xlu0 %341 }
  0xb1   : > { %v344_v30 = vmul.f32 0.03125, %v342_v29 }
  0xb2   : > { %v425_v31 = vsub.f32 %v409_v11, %v421_v27  ;;  %v423_v32 = vsub.f32 %v407_v12, %v419_v28 }
  0xb3   : > { %v346_v34 = vsub.f32 %v338_v13, %v344_v30  ;;  %v1078_v30 = vld [vmem:[%s1567_s2] ss:$0 sm:$0xff] }
  0xb4   : > { %v1449_v35 = vsel %vm334_vm0, %v425_v31, 0.0  ;;  %v1452_v36 = vsel %vm334_vm0, %v423_v32, 0.0 }
  0xb5   : > { %v433_v37 = vmul.f32 %v1449_v35, %v1449_v35  ;;  %v431_v38 = vmul.f32 %v1452_v36, %v1452_v36  ;;  %v1459_v39 = vsel %vm334_vm0, %v346_v34, 0.0 }
  0xb6   : > { %v350_v40 = vmul.f32 %v1459_v39, %v1459_v39 }
  0xb7   : > { %440 = vadd.xlane.f32.xlu2 %v433_v37 }
  0xb8   : > { %436 = vadd.xlane.f32.xlu0 %v431_v38  ;;  %353 = vadd.xlane.f32.xlu1 %v350_v40 }
  0xc0   : > { %438 = vadd.xlane.f32.xlu1 %v432_v43 }
 0x122   : > { %v435_v44 = vpop.xlane.xlu2 %434 }
 0x123   : > { %v442_v45 = vmul.f32 0.03125, %v435_v44  ;;  %v352_v46 = vpop.xlane.xlu0 %351 }
 0x124   : > { %v355_v47 = vmul.f32 0.03125, %v352_v46 }
 0x125   : > { %v446_v48 = vadd.f32 1e-05, %v442_v45  ;;  %v1079_v45 = vld [vmem:[%s1568_s3] ss:$0 sm:$0xff] }
 0x126   : > { %v357_v49 = vadd.f32 1e-05, %v355_v47 }
 0x127   : > { %1080 = vrsqrt.f32 %v446_v48  ;;  %vm456_vm2 = vweird.f32 %v446_v48 }
 0x128   : > { %1082 = vrsqrt.f32 %v357_v49  ;;  %vm365_vm3 = vweird.f32 %v357_v49 }
 0x12a   : > { %v441_v50 = vpop.xlane.xlu2 %440 }
 0x12b   : > { %v445_v51 = vmul.f32 0.03125, %v441_v50  ;;  %v354_v52 = vpop.xlane.xlu1 %353  ;;  %v437_v53 = vpop.xlane.xlu0 %436 }
 0x12c   : > { %v356_v54 = vmul.f32 0.03125, %v354_v52  ;;  %v443_v55 = vmul.f32 0.03125, %v437_v53 }
 0x12d   : > { %v1081_v56 = vpop.eup %1080  ;;  %v449_v57 = vadd.f32 1e-05, %v445_v51 }
 0x12e   : > { %v1083_v58 = vpop.eup %1082  ;;  %v451_v59 = vmul.f32 %v1081_v56, %v446_v48  ;;  %v358_v60 = vadd.f32 1e-05, %v356_v54  ;;  %v447_v61 = vadd.f32 1e-05, %v443_v55  ;;  %vm457_vm4 = vweird.f32 %v1081_v56 }
 0x12f   : > { %v360_v62 = vmul.f32 %v1083_v58, %v357_v49  ;;  %1084 = vrsqrt.f32 %v449_v57  ;;  %vm366_vm1 = vweird.f32 %v1083_v58  ;;  %vm1471_vm6 = vmor %vm456_vm2, %vm457_vm4  ;;  %vm486_vm7 = vweird.f32 %v449_v57 }
 0x130   : > { %v452_v63 = vmul.f32 %v1081_v56, %v451_v59  ;;  %1086 = vrsqrt.f32 %v358_v60  ;;  %vm367_vm5 = vmor %vm365_vm3, %vm366_vm1  ;;  %vm466_vm10 = vweird.f32 %v447_v61  ;;  %vm375_vm13 = vweird.f32 %v358_v60 }
 0x131   : > { %v361_v0 = vmul.f32 %v1083_v58, %v360_v62  ;;  %1088 = vrsqrt.f32 %v447_v61  ;;  %vm635_vm3 = vcmask 1043456   ;;  %vm562_vm4 = vcmask 64512  }
 0x132   : > { %v453_v1 = vmul.f32 0.5, %v452_v63 }
 0x133   : > { %v362_v2 = vmul.f32 0.5, %v361_v0  ;;  %v439_v3 = vpop.xlane.xlu1 %438 }
 0x134   : > { %v444_v4 = vmul.f32 0.03125, %v439_v3  ;;  %v454_v6 = vsub.f32 1.5, %v453_v1 }
 0x135   : > { %v1085_v5 = vpop.eup %1084  ;;  %v363_v7 = vsub.f32 1.5, %v362_v2 }
 0x136   : > { %v1087_v8 = vpop.eup %1086  ;;  %v481_v9 = vmul.f32 %v1085_v5, %v449_v57  ;;  %v1468_v10 = vadd.f32 1e-05, %v444_v4  ;;  %v455_v16 = vmul.f32 %v1081_v56, %v454_v6  ;;  %vm487_vm8 = vweird.f32 %v1085_v5 }
 0x137   : > { %v1089_v11 = vpop.eup %1088  ;;  %v364_v12 = vmul.f32 %v1083_v58, %v363_v7  ;;  %v370_v13 = vmul.f32 %v1087_v8, %v358_v60  ;;  %vm376_vm9 = vweird.f32 %v1087_v8  ;;  %vm488_vm12 = vmor %vm486_vm7, %vm487_vm8 }
 0x138   : > { %v482_v14 = vmul.f32 %v1085_v5, %v481_v9  ;;  %v461_v15 = vmul.f32 %v1089_v11, %v447_v61  ;;  %1090 = vrsqrt.f32 %v1468_v10  ;;  %v459_v27 = vsel %vm1471_vm6, %v1081_v56, %v455_v16  ;;  %vm377_vm14 = vmor %vm375_vm13, %vm376_vm9 }
 0x139   : > { %v371_v17 = vmul.f32 %v1087_v8, %v370_v13  ;;  %v368_v20 = vsel %vm367_vm5, %v1083_v58, %v364_v12  ;;  %vm467_vm11 = vweird.f32 %v1089_v11  ;;  %v490_v37 = vmul.f32 %v459_v27, %v1439_v21 }
 0x13a   : > { %v483_v18 = vmul.f32 0.5, %v482_v14  ;;  %v462_v19 = vmul.f32 %v1089_v11, %v461_v15  ;;  %v379_v29 = vmul.f32 %v368_v20, %v1444_v23  ;;  %vm468_vm15 = vmor %vm466_vm10, %vm467_vm11  ;;  %vm476_vm1 = vweird.f32 %v1468_v10 }
 0x13b   : > { %v372_v22 = vmul.f32 0.5, %v371_v17  ;;  %v497_v51 = vmul.f32 %v1078_v30, %v490_v37  ;;  %vm707_vm5 = vcmask 130048  }
 0x13c   : > { %v484_v25 = vsub.f32 1.5, %v483_v18  ;;  %v463_v26 = vmul.f32 0.5, %v462_v19  ;;  %v384_v44 = vmul.f32 %v1078_v30, %v379_v29 }
 0x13d   : > { %v373_v28 = vsub.f32 1.5, %v372_v22  ;;  %v504_v59 = vadd.f32 %v1079_v45, %v497_v51 }
 0x13e   : > { %v485_v31 = vmul.f32 %v1085_v5, %v484_v25  ;;  %v464_v32 = vsub.f32 1.5, %v463_v26  ;;  %v1091_v33 = vpop.eup %1090 }
 0x13f   : > { %v374_v34 = vmul.f32 %v1087_v8, %v373_v28  ;;  %v471_v41 = vmul.f32 %v1091_v33, %v1468_v10  ;;  %vm477_vm0 = vweird.f32 %v1091_v33  ;;  %v508_v63 = vpack.c.bf16 %v504_v59, %v504_v59 }
 0x140   : > { %v489_v38 = vsel %vm488_vm12, %v1085_v5, %v485_v31  ;;  %v465_v40 = vmul.f32 %v1089_v11, %v464_v32  ;;  %vm478_vm2 = vmor %vm476_vm1, %vm477_vm0  ;;  %v512_v1 = vmul.f32 0.17677669, %v504_v59 }
 0x141   : > { %v493_v23 = vmul.f32 %v489_v38, %v1449_v35  ;;  %v378_v43 = vsel %vm377_vm14, %v1087_v8, %v374_v34  ;;  %v472_v48 = vmul.f32 %v1091_v33, %v471_v41  ;;  %v389_v35 = vadd.f32 %v1079_v45, %v384_v44 }
 0x142   : > { %v380_v46 = vmul.f32 %v378_v43, %v1459_v39  ;;  %v469_v47 = vsel %vm468_vm15, %v1089_v11, %v465_v40  ;;  %v703_v7 = vunpack.c.l.b16 %v508_v63  ;;  %v516_v11 = vpack.c.bf16 %v512_v1, %v512_v1 }
 0x143   : > { %v491_v21 = vmul.f32 %v469_v47, %v1452_v36  ;;  %v473_v50 = vmul.f32 0.5, %v472_v48  ;;  %v500_v53 = vmul.f32 %v1078_v30, %v493_v23 }
 0x144   : > { %v385_v49 = vmul.f32 %v1078_v30, %v380_v46  ;;  %v524_v22 = vunpack.c.l.b16 %v516_v11 }
 0x145   : > { %v498_v52 = vmul.f32 %v1078_v30, %v491_v21  ;;  %v474_v55 = vsub.f32 1.5, %v473_v50  ;;  %v507_v39 = vadd.f32 %v1079_v45, %v500_v53 }
 0x146   : > { %v390_v54 = vadd.f32 %v1079_v45, %v385_v49 }
 0x147   : > { %v505_v56 = vadd.f32 %v1079_v45, %v498_v52  ;;  %v475_v58 = vmul.f32 %v1091_v33, %v474_v55  ;;  %v515_v2 = vmul.f32 0.17677669, %v507_v39  ;;  %v511_v5 = vpack.c.bf16 %v507_v39, %v507_v39 }
 0x148   : > { %v996_v57 = vpack.c.bf16 %v390_v54, %v389_v35 }
 0x149   : > { %v479_v60 = vsel %vm478_vm2, %v1091_v33, %v475_v58  ;;  %v509_v36 = vpack.c.bf16 %v505_v56, %v505_v56  ;;  %v513_v62 = vmul.f32 0.17677669, %v505_v56  ;;  %v519_v13 = vpack.c.bf16 %v515_v2, %v515_v2 }
 0x14a   : > { %997 = vst [vmem:[#allocation2] sm:$0xff] %v996_v57   ;;  %v492_v61 = vmul.f32 %v479_v60, %v1464_v42  ;;  %v744_v17 = vunpack.c.l.b16 %v511_v5 }
 0x14b   : > { %v704_v3 = vunpack.c.l.b16 %v509_v36  ;;  %v517_v6 = vpack.c.bf16 %v513_v62, %v513_v62  ;;  %v545_v25 = vunpack.c.l.b16 %v519_v13 }
 0x14c   : > { %v499_v0 = vmul.f32 %v1078_v30, %v492_v61 }
 0x14d   : > { %v705_v15 = vpack.c.b16 %v704_v3, %v703_v7  ;;  %v525_v18 = vunpack.c.l.b16 %v517_v6 }
 0x14e   : > { %v506_v4 = vadd.f32 %v1079_v45, %v499_v0 }
 0x14f   : > { %v526_v26 = vpack.c.b16 %v525_v18, %v524_v22 }
 0x150   : > { %v510_v10 = vpack.c.bf16 %v506_v4, %v506_v4  ;;  %v514_v12 = vmul.f32 0.17677669, %v506_v4 }
 0x151   : > { %v520_v8 = vld [vmem:[#allocation2] sm:$0xf]  ;;  %v521_v9 = vld [vmem:[#allocation2 + $0x4] sm:$0xf] }
 0x152   : > { %535 = vmatpush.bf16.xpose.msra.mxu0 %v520_v8  ;;  %555 = vmatpush.bf16.xpose.msra.mxu1 %v521_v9  ;;  %v637_v42 = vsel %vm635_vm3, %v520_v8, 0  ;;  %v662_v14 = vsel %vm635_vm3, %v521_v9, 0  ;;  %v743_v16 = vunpack.c.l.b16 %v510_v10  ;;  %v518_v19 = vpack.c.bf16 %v514_v12, %v514_v12 }
 0x153   : > { %646 = vmatpush.bf16.msra.mxu2 %v637_v42  ;;  %671 = vmatpush.bf16.msra.mxu3 %v662_v14 }
 0x154   : > { %v745_v20 = vpack.c.b16 %v744_v17, %v743_v16  ;;  %v544_v24 = vunpack.c.l.b16 %v518_v19 }
 0x156   : > { %v546_v27 = vpack.c.b16 %v545_v25, %v544_v24 }
 0x157   : > { %718 = vmatpush.bf16.msrb.mxu2 %v705_v15  ;;  %757 = vmatpush.bf16.msrb.mxu3 %v745_v20 }
 0x159   : > { %536 = vmatmul.bf16.vlgmr.msra.gmra.mxu0 %v526_v26  ;;  %556 = vmatmul.bf16.vlgmr.msra.gmra.mxu1 %v546_v27 }
 0x1d6   : > { %v537_v28 = vpop.f32.mrf.mxu0  ;;  %v557_v29 = vpop.f32.mrf.mxu1 }
 0x1d7   : > { %v569_v30 = vsel %vm562_vm4, %v557_v29, -inf  ;;  %v563_v31 = vsel %vm562_vm4, %v537_v28, -inf }
 0x1d8   : > { %570 = vmax.xlane.f32.xlu2 %v569_v30  ;;  %564 = vmax.xlane.f32.xlu0 %v563_v31 }
 0x1de   : > { %v539_v32 = vpop.f32.mrf.mxu0  ;;  %v559_v33 = vpop.f32.mrf.mxu1 }
 0x1df   : > { %v572_v34 = vsel %vm562_vm4, %v559_v33, -inf  ;;  %v566_v37 = vsel %vm562_vm4, %v539_v32, -inf }
 0x1e0   : > { %573 = vmax.xlane.f32.xlu0 %v572_v34  ;;  %567 = vmax.xlane.f32.xlu1 %v566_v37 }
 0x24b   : > { %v571_v38 = vpop.xlane.xlu2 %570  ;;  %v565_v40 = vpop.xlane.xlu0 %564 }
 0x24c   : > { %v577_v41 = vsub.f32 %v557_v29, %v571_v38  ;;  %v575_v23 = vsub.f32 %v537_v28, %v565_v40 }
 0x24e   : > { %v581_v43 = vpack.c.bf16 %v577_v41, %v577_v41  ;;  %v579_v44 = vpack.c.bf16 %v575_v23, %v575_v23 }
 0x250   : > { %v585_v45 = vunpack.c.l.bf16 %v581_v43  ;;  %v583_v46 = vunpack.c.l.bf16 %v579_v44 }
 0x252   : > { %v591_v47 = vmul.f32 1.442695, %v585_v45  ;;  %v587_v48 = vmul.f32 1.442695, %v583_v46 }
 0x253   : > { %v574_v21 = vpop.xlane.xlu0 %573  ;;  %v568_v49 = vpop.xlane.xlu1 %567 }
 0x254   : > { %1092 = vpow2.f32 %v591_v47  ;;  %v578_v50 = vsub.f32 %v559_v33, %v574_v21  ;;  %v576_v51 = vsub.f32 %v539_v32, %v568_v49 }
 0x255   : > { %1094 = vpow2.f32 %v587_v48 }
 0x256   : > { %v582_v52 = vpack.c.bf16 %v578_v50, %v578_v50  ;;  %v580_v53 = vpack.c.bf16 %v576_v51, %v576_v51 }
 0x258   : > { %v586_v35 = vunpack.c.l.bf16 %v582_v52  ;;  %v584_v54 = vunpack.c.l.bf16 %v580_v53 }
 0x25a   : > { %v1093_v55 = vpop.eup %1092  ;;  %v593_v56 = vmul.f32 1.442695, %v586_v35  ;;  %v589_v57 = vmul.f32 1.442695, %v584_v54 }
 0x25b   : > { %v1095_v58 = vpop.eup %1094  ;;  %v597_v59 = vpack.c.bf16 %v1093_v55, %v1093_v55 }
 0x25c   : > { %1096 = vpow2.f32 %v593_v56  ;;  %v595_v39 = vpack.c.bf16 %v1095_v58, %v1095_v58 }
 0x25d   : > { %1098 = vpow2.f32 %v589_v57  ;;  %v601_v60 = vunpack.c.l.bf16 %v597_v59 }
 0x25e   : > { %v599_v36 = vunpack.c.l.bf16 %v595_v39 }
 0x25f   : > { %v609_v61 = vsel %vm562_vm4, %v601_v60, 0.0 }
 0x260   : > { %610 = vadd.xlane.f32.xlu0 %v609_v61  ;;  %v603_v62 = vsel %vm562_vm4, %v599_v36, 0.0 }
 0x261   : > { %604 = vadd.xlane.f32.xlu1 %v603_v62 }
 0x262   : > { %v1097_v63 = vpop.eup %1096 }
 0x263   : > { %v1099_v0 = vpop.eup %1098  ;;  %v598_v1 = vpack.c.bf16 %v1097_v63, %v1097_v63 }
 0x264   : > { %v596_v2 = vpack.c.bf16 %v1099_v0, %v1099_v0 }
 0x265   : > { %v602_v3 = vunpack.c.l.bf16 %v598_v1 }
 0x266   : > { %v600_v4 = vunpack.c.l.bf16 %v596_v2 }
 0x267   : > { %v612_v5 = vsel %vm562_vm4, %v602_v3, 0.0 }
 0x268   : > { %v606_v6 = vsel %vm562_vm4, %v600_v4, 0.0 }
 0x269   : > { %613 = vadd.xlane.f32.xlu1 %v612_v5  ;;  %607 = vadd.xlane.f32.xlu2 %v606_v6 }
 0x2d3   : > { %v611_v8 = vpop.xlane.xlu0 %610 }
 0x2d4   : > { %v605_v7 = vpop.xlane.xlu1 %604 }
 0x2d5   : > { %1100 = vrcp.f32 %v605_v7 }
 0x2d6   : > { %1102 = vrcp.f32 %v611_v8 }
 0x2db   : > { %v1101_v11 = vpop.eup %1100 }
 0x2dc   : > { %v608_v9 = vpop.xlane.xlu2 %607  ;;  %v614_v10 = vpop.xlane.xlu1 %613  ;;  %v619_v13 = vmul.f32 %v1101_v11, %v599_v36 }
 0x2dd   : > { %1104 = vrcp.f32 %v608_v9  ;;  %v1103_v12 = vpop.eup %1102 }
 0x2de   : > { %1106 = vrcp.f32 %v614_v10  ;;  %v621_v42 = vmul.f32 %v1103_v12, %v601_v60  ;;  %v623_v17 = vpack.c.bf16 %v619_v13, %v619_v13 }
 0x2e0   : > { %v625_v19 = vpack.c.bf16 %v621_v42, %v621_v42  ;;  %v629_v24 = vunpack.c.l.b16 %v623_v17 }
 0x2e2   : > { %v655_v26 = vunpack.c.l.b16 %v625_v19 }
 0x2e3   : > { %v1105_v14 = vpop.eup %1104 }
 0x2e4   : > { %v1107_v15 = vpop.eup %1106  ;;  %v620_v16 = vmul.f32 %v1105_v14, %v600_v4 }
 0x2e5   : > { %v622_v18 = vmul.f32 %v1107_v15, %v602_v3 }
 0x2e6   : > { %v624_v20 = vpack.c.bf16 %v620_v16, %v620_v16 }
 0x2e7   : > { %v626_v22 = vpack.c.bf16 %v622_v18, %v622_v18 }
 0x2e8   : > { %v630_v25 = vunpack.c.l.b16 %v624_v20 }
 0x2e9   : > { %v656_v27 = vunpack.c.l.b16 %v626_v22 }
 0x2ea   : > { %v631_v28 = vpack.c.b16 %v630_v25, %v629_v24 }
 0x2eb   : > { %v657_v29 = vpack.c.b16 %v656_v27, %v655_v26 }
 0x2ec   : > { %974 = vmatmul.msk.bf16.vlgmr.msra.gmra.mxu2 %vm562_vm4, %v631_v28 }
 0x2ed   : > { %1075 = vxpose.binary.xlu2.c.b16.start.end [1/2] (short) (narrow) %v657_v29, %v631_v28, 16 }
 0x2ee   : > { %975 = vmatmul.msk.bf16.vlgmr.msra.gmra.mxu3 %vm562_vm4, %v657_v29 }
 0x36f   : > { %v648_v30 = vpop.f32.mrf.mxu2 }
 0x370   : > { %678 = vst [vmem:[%s309_s10] sm:$0xff] %v648_v30 }
 0x371   : > { %v673_v31 = vpop.f32.mrf.mxu3 }
 0x372   : > { %680 = vst [vmem:[%s309_s10 + $0x10] sm:$0xff] %v673_v31 }
 0x377   : > { %v650_v32 = vpop.f32.mrf.mxu2 }
 0x378   : > { %679 = vst [vmem:[%s309_s10 + $0x8] sm:$0xff] %v650_v32 }
 0x379   : > { %v675_v33 = vpop.f32.mrf.mxu3 }
 0x37a   : > { %681 = vst [vmem:[%s309_s10 + $0x18] sm:$0xff] %v675_v33 }
 0x38e   : > { %v1076_v34 = vpop.trf.xlu2 }
 0x38f   : > { %976 = vmatmul.msk.bf16.vlgmr.msrb.gmra.mxu2 %vm707_vm5, %v1076_v34 }
 0x396   : > { %v1077_v37 = vpop.trf.xlu2 }
 0x397   : > { %977 = vmatmul.msk.bf16.vlgmr.msrb.gmra.mxu3 %vm707_vm5, %v1077_v37 }
 0x398   : > { %1195 = shalt.err (!%p1192_p13)
}
 0x399   : > { %s1290_s10 = smov 128   ;;  %s1291_s13 = smov 8  }
 0x39a   : > { %1002 = dma.vmem_to_hbm [thread:$0]  (%p1373_p9), %s796_s12, 512, %s798_s17, %s775_s25, %s1290_s10, %s1290_s10, %s1291_s13  }
 0x39b   : > { %s992_s28 = sshll.u32 %s1278_s21, 4  ;;  %s316_s14 = scalar_lea.vmem [#allocation10], %s971_s0 }
 0x39c   : > { %s811_s26 = scalar_lea.hbm %s1570_s5, %s992_s28  ;;  %s812_s9 = sshll.u32 %s316_s14, 4  ;;  %s813_s9 = int_to_ptr.vmem [resolvable:$true] %s812_s9 }
 0x39d   : > { %s814_s30 = sshll.u32 %s811_s26, 4  ;;  %s780_s24 = scalar_lea.sflag [#allocation11], %s1414_s16  ;;  %s815_s30 = int_to_ptr.hbm [resolvable:$true] %s814_s30 }
 0x39e   : > { %s1210_s27 = sshra.s32 %s815_s30, 4  ;;  %s1216_s17 = scalar_lea.hbm %s1570_s5, 32  ;;  %s1211_s27 = int_to_ptr.hbm [resolvable:$true] %s1210_s27 }
 0x39f   : > { %s1212_s21 = scalar_lea.hbm %s1211_s27, 16  ;;  %p1217_p3 = scmp.lt.s32.totalorder %s1211_s27, %s1570_s5 }
 0x3a0   : > { %p1213_p0 = scmp.ne.s32.totalorder %s1211_s27, %s1212_s21  ;;  %p1218_p4 = scmp.lt.s32.totalorder %s1216_s17, %s1212_s21 }
 0x3a2   : > { %p1214_p1 = pnand %p1213_p0, %p1373_p9  ;;  %p1219_p5 = por %p1218_p4, %p1217_p3 }
 0x3a4   : > { %p1215_p2 = pneg %p1214_p1 }
 0x3a6   : > { %p1220_p6 = pnand %p1219_p5, %p1215_p2 }
 0x412   : > { %v720_v38 = vpop.f32.mrf.mxu2 }
 0x413   : > { %772 = vst [vmem:[%s316_s14] sm:$0xff] %v720_v38 }
 0x41a   : > { %v722_v40 = vpop.f32.mrf.mxu2  ;;  %v759_v41 = vpop.f32.mrf.mxu3 }
 0x41b   : > { %773 = vst [vmem:[%s316_s14 + $0x8] sm:$0xff] %v759_v41 }
 0x41c   : > { %1223 = shalt.err (!%p1220_p6)
}
 0x41d   : > { %1003 = dma.vmem_to_hbm [thread:$0]  (%p1373_p9), %s813_s9, 256, %s815_s30, %s780_s24, %s1290_s10, %s1290_s10, %s1291_s13  }
 0x422   : > { %v761_v23 = vpop.f32.mrf.mxu3 }
 0x423 PF: > { %s829_s16 = sand.u32 1, %s1266_s18   ;;  %p1014_p7 = pnand %p961_p12, %p1380_p11 }
 0x424   : > { %s830_s28 = scalar_lea.sflag [#allocation6], %s829_s16 }
 0x425   : > { %p1015_p8 = pneg %p1014_p7 }
 0x427   : > { %1257 = dma.done.wait (%p1015_p8), %s830_s28, 512  }
 0x428   : > { %1259 = vsyncadd (%p1015_p8), %s830_s28, 4294966784  ;;  %s840_s14 = scalar_lea.sflag [#allocation11], %s829_s16 }
 0x429   : > { %1261 = dma.done.wait (%p1015_p8), %s840_s14, 256  }
 0x42a   : > { %1263 = vsyncadd (%p1015_p8), %s840_s14, 4294967040  ;;  %s28_s23 = sadd.s32 1, %s1286_s23   ;;  %s1582_s6 = sld [smem:[#allocation16_spill]] }
 0x42b   : > { %p25_p10 = scmp.ge.s32.totalorder %s28_s23, 4   ;;  %s1583_s18 = smov %s1270_s19 }
 0x42c   : > { %s1584_s19 = smov %s1274_s20  ;;  %s1585_s20 = smov %s1378_s7 }
 0x42d   : > { %s1586_s21 = smov %s1282_s22  ;;  %27 = sbr.rel (!%p25_p10) target bundleno = 12 (0xc), region = 119 }
 0x430   : > { %s1587_s22 = smov %s1582_s6 }
 0x432   :  { %846 = vsyncpa [#allocation5], 1 }
 0x433   :  { %848 = vsyncpa [#allocation5 + $0x1], 1 }
 0x434   :  { %849 = vsyncpa [#allocation8], 1 }
 0x435   :  { %851 = vsyncpa [#allocation8 + $0x1], 1 }
 0x436   :  { %852 = vsyncpa [#allocation6], 1 }
 0x437   :  { %854 = vsyncpa [#allocation6 + $0x1], 1 }
 0x438   :  { %855 = vsyncpa [#allocation11], 1 }
 0x439   :  { %857 = vsyncpa [#allocation11 + $0x1], 1 }

</bundles_post_ra>
